<compile_context>
chip_gen: v6e
topology: v6e:2x2x1
jax: 0.10.0
libtpu: 0.0.40
codegen_flags: <defaults>
</compile_context>

<pallas_src>
import functools
import math

import jax
import jax.numpy as jnp
from jax.experimental import pallas as pl
from jax.experimental.pallas import tpu as pltpu


# -----------------------------------------------------------------------------
# In-kernel helpers (traced inside Pallas bodies)
# -----------------------------------------------------------------------------
def _gelu(y):
    # exact (erf) gelu, like HF "gelu"
    return 0.5 * y * (1.0 + jax.lax.erf(y * 0.7071067811865475))


def _ln(x, g, b, eps):
    mean = jnp.mean(x, axis=-1, keepdims=True)
    var = jnp.mean(jnp.square(x - mean), axis=-1, keepdims=True)
    return (x - mean) * jax.lax.rsqrt(var + eps) * g + b


def _round_up(x, m):
    return ((x + m - 1) // m) * m


# -----------------------------------------------------------------------------
# Small row-tiled kernels for embedding-side glue (one-off, small tensors)
# -----------------------------------------------------------------------------
def _linear_kernel(x_ref, w_ref, b_ref, o_ref):
    y = jnp.dot(x_ref[...].astype(jnp.bfloat16), w_ref[...],
                preferred_element_type=jnp.float32)
    o_ref[...] = (y + b_ref[...]).astype(o_ref.dtype)


def pallas_linear(x, w_bf16, b, *, tile_m=256):
    """x:(M,K) f32 @ w:(K,N) bf16 + b:(N,) f32 -> (M,N) f32, row-tiled."""
    M, K = x.shape
    N = w_bf16.shape[1]
    tm = min(tile_m, _round_up(M, 8))
    m_pad = _round_up(M, tm)
    if m_pad != M:
        x = jnp.pad(x, ((0, m_pad - M), (0, 0)))
    out = pl.pallas_call(
        _linear_kernel,
        grid=(m_pad // tm,),
        in_specs=[pl.BlockSpec((tm, K), lambda i: (i, 0)),
                  pl.BlockSpec((K, N), lambda i: (0, 0)),
                  pl.BlockSpec((1, N), lambda i: (0, 0))],
        out_specs=pl.BlockSpec((tm, N), lambda i: (i, 0)),
        out_shape=jax.ShapeDtypeStruct((m_pad, N), jnp.float32),
        compiler_params=pltpu.CompilerParams(dimension_semantics=("parallel",)),
    )(x, w_bf16, b.reshape(1, N))
    return out[:M]


def _layernorm_kernel(x_ref, g_ref, b_ref, o_ref, *, eps):
    x = x_ref[...].astype(jnp.float32)
    o_ref[...] = _ln(x, g_ref[...], b_ref[...], eps).astype(o_ref.dtype)


def pallas_layernorm(x, gamma, beta, *, eps=1e-5, tile_m=512):
    """Row-tiled LayerNorm over the last dim; x:(M,D) -> (M,D)."""
    M, D = x.shape
    tm = min(tile_m, _round_up(M, 8))
    m_pad = _round_up(M, tm)
    if m_pad != M:
        x = jnp.pad(x, ((0, m_pad - M), (0, 0)))
    out = pl.pallas_call(
        functools.partial(_layernorm_kernel, eps=eps),
        grid=(m_pad // tm,),
        in_specs=[pl.BlockSpec((tm, D), lambda i: (i, 0)),
                  pl.BlockSpec((1, D), lambda i: (0, 0)),
                  pl.BlockSpec((1, D), lambda i: (0, 0))],
        out_specs=pl.BlockSpec((tm, D), lambda i: (i, 0)),
        out_shape=jax.ShapeDtypeStruct((m_pad, D), x.dtype),
        compiler_params=pltpu.CompilerParams(dimension_semantics=("parallel",)),
    )(x, gamma.reshape(1, D), beta.reshape(1, D))
    return out[:M]


# -----------------------------------------------------------------------------
# Fully fused encoder: ALL layers in one pallas_call.
#   grid = (batch_blocks, layers); residual kept in f32 VMEM scratch across the
#   layer axis; weights streamed per layer; rel-pos bias (+mask) held in VMEM
#   for the whole layer loop of a batch block and sliced per head.
# -----------------------------------------------------------------------------
def _encoder_kernel(x_ref, bias_ref,
                    qkv_w_ref, qkv_b_ref, ao_w_ref, ao_b_ref,
                    ln1_g_ref, ln1_b_ref,
                    i_w_ref, i_b_ref, o_w_ref, o_b_ref,
                    ln2_g_ref, ln2_b_ref,
                    out_ref, h_scr, *, num_heads, head_dim, bt, s_pad):
    H = num_heads * head_dim
    M = bt * s_pad

    # layer 0: initialize the VMEM-resident residual stream from the embeddings
    @pl.when(pl.program_id(1) == 0)
    def _():
        h_scr[...] = x_ref[...].astype(jnp.float32)

    x = h_scr[...].reshape(M, H)                                  # (M,H) f32 layer input

    # ---- fused QKV projection: Bt*S rows into the MXU, bf16 operands, f32 acc.
    #      (1/sqrt(head_dim) already folded into the Q third of qkv_w)
    qkv = jnp.dot(x.astype(jnp.bfloat16), qkv_w_ref[0],
                  preferred_element_type=jnp.float32) + qkv_b_ref[0]
    qkv3 = qkv.reshape(bt, s_pad, 3 * H)

    ao_w = ao_w_ref[0]                                            # (H,H) bf16

    # ---- multi-head attention; each head's context is accumulated directly
    #      into the output projection via a 32/64-row (sublane-aligned) slice
    #      of ao_w -> no lane-dim concat of head parts.
    attn = None
    for hh in range(num_heads):
        lo = hh * head_dim
        qh = qkv3[:, :, lo:lo + head_dim].astype(jnp.bfloat16)
        kh = qkv3[:, :, H + lo:H + lo + head_dim].astype(jnp.bfloat16)
        vh = qkv3[:, :, 2 * H + lo:2 * H + lo + head_dim].astype(jnp.bfloat16)
        s = jnp.einsum('bqd,bkd->bqk', qh, kh,
                       preferred_element_type=jnp.float32)
        # per-head bias load (bf16 block stays resident; only one (Bt,S,S) f32
        # slab live at a time); attention mask is already folded in.
        s = s + bias_ref[hh].astype(jnp.float32)
        m = jnp.max(s, axis=-1, keepdims=True)
        p = jnp.exp(s - m)
        denom = jnp.sum(p, axis=-1, keepdims=True)
        ch = jnp.einsum('bqk,bkd->bqd', p.astype(jnp.bfloat16), vh,
                        preferred_element_type=jnp.float32)
        ch = ch * pl.reciprocal(denom, approx=False)              # exact, per review
        part = jnp.dot(ch.reshape(M, head_dim).astype(jnp.bfloat16),
                       ao_w[lo:lo + head_dim, :],
                       preferred_element_type=jnp.float32)
        attn = part if attn is None else attn + part

    attn = attn + ao_b_ref[0]
    h1 = _ln(attn + x, ln1_g_ref[0], ln1_b_ref[0], 1e-5)

    # ---- MLP (GELU) + residual + LN2 ----
    inter = jnp.dot(h1.astype(jnp.bfloat16), i_w_ref[0],
                    preferred_element_type=jnp.float32) + i_b_ref[0]
    inter = _gelu(inter)
    mlp = jnp.dot(inter.astype(jnp.bfloat16), o_w_ref[0],
                  preferred_element_type=jnp.float32) + o_b_ref[0]
    h2 = _ln(mlp + h1, ln2_g_ref[0], ln2_b_ref[0], 1e-5)

    h_scr[...] = h2.reshape(bt, s_pad, H)                         # stays f32 in VMEM
    out_ref[...] = h2.reshape(1, bt, s_pad, H).astype(out_ref.dtype)   # bf16 to HBM


def pallas_encoder(enc, emb_bf16, bias_bf16, cfg, *, bt):
    """emb:(B,S_pad,H) bf16; bias(+mask):(NH,B,S_pad,S_pad) bf16 ->
       per-layer hidden states (L,B,S_pad,H) bf16 in a single pallas_call."""
    B, S_pad, H = emb_bf16.shape
    NH, HD, I, L = cfg["heads"], cfg["head_dim"], cfg["intermediate"], cfg["layers"]

    def wspec(shape):  # per-layer stacked weight: block index follows the layer axis
        return pl.BlockSpec((1,) + shape, lambda b, l: (l,) + (0,) * len(shape))

    kernel = functools.partial(_encoder_kernel, num_heads=NH, head_dim=HD,
                               bt=bt, s_pad=S_pad)

    # explicit scoped-VMEM budget (double-buffered blocks + scratch + margin)
    blk_bytes = (2 * (bt * S_pad * H * 2)                      # x (bf16)
                 + 2 * (NH * bt * S_pad * S_pad * 2)           # bias (bf16)
                 + 2 * (bt * S_pad * H * 2)                    # out (bf16)
                 + 2 * 2 * (H * 3 * H + H * H + H * I + I * H)  # bf16 weights
                 + 4 * (bt * S_pad * H)                        # f32 residual scratch
                 + (1 << 20))
    vmem_limit = int(min(96 * 1024 * 1024, max(32 * 1024 * 1024, 2 * blk_bytes)))

    return pl.pallas_call(
        kernel,
        grid=(B // bt, L),
        in_specs=[
            pl.BlockSpec((bt, S_pad, H), lambda b, l: (b, 0, 0)),            # emb (read @ l==0)
            pl.BlockSpec((NH, bt, S_pad, S_pad), lambda b, l: (0, b, 0, 0)),  # bias(+mask)
            wspec((H, 3 * H)), wspec((1, 3 * H)),                            # qkv
            wspec((H, H)), wspec((1, H)),                                    # attn out proj
            wspec((1, H)), wspec((1, H)),                                    # ln1
            wspec((H, I)), wspec((1, I)),                                    # intermediate
            wspec((I, H)), wspec((1, H)),                                    # mlp out
            wspec((1, H)), wspec((1, H)),                                    # ln2
        ],
        out_specs=pl.BlockSpec((1, bt, S_pad, H), lambda b, l: (l, b, 0, 0)),
        out_shape=jax.ShapeDtypeStruct((L, B, S_pad, H), jnp.bfloat16),
        scratch_shapes=[pltpu.VMEM((bt, S_pad, H), jnp.float32)],
        compiler_params=pltpu.CompilerParams(
            dimension_semantics=("parallel", "arbitrary"),
            vmem_limit_bytes=vmem_limit),
    )(emb_bf16, bias_bf16,
      enc["qkv_w"], enc["qkv_b"], enc["ao_w"], enc["ao_b"],
      enc["ln1_g"], enc["ln1_b"],
      enc["i_w"], enc["i_b"], enc["o_w"], enc["o_b"],
      enc["ln2_g"], enc["ln2_b"])


def _pick_bt(B, NH, S_pad, H):
    """Largest batch block dividing B with modest per-step VMEM blocks (feeds the
    MXU Bt*S_pad rows per GEMM)."""
    for bt in range(min(B, 8), 0, -1):
        if B % bt != 0:
            continue
        bias_bytes = NH * bt * S_pad * S_pad * 2
        act_bytes = bt * S_pad * H * 4
        if bias_bytes <= (8 << 20) and act_bytes <= (4 << 20):
            return bt
    return 1


# -----------------------------------------------------------------------------
# Config, synthetic params, LayoutLMv3-style helpers (plain JAX glue)
# -----------------------------------------------------------------------------
CFG = dict(
    hidden=128, heads=4, head_dim=32, intermediate=256, layers=2,
    vocab=64, max_pos=32, pad_id=1,
    coord_size=22, shape_size=20, max_2d_pos=1024,
    rel_pos_bins=32, max_rel_pos=128,
    rel_2d_pos_bins=64, max_rel_2d_pos=256,
    image_size=32, patch=16, channels=3,
    select_layer=-2, select_feature="patch",
)


def init_params(cfg, key):
    keys = iter(jax.random.split(key, 96))

    def nrm(shape, scale=0.02):
        return scale * jax.random.normal(next(keys), shape, dtype=jnp.float32)

    H, I, L = cfg["hidden"], cfg["intermediate"], cfg["layers"]
    NH, HD = cfg["heads"], cfg["head_dim"]
    C, p = cfg["channels"], cfg["patch"]
    n_vis = (cfg["image_size"] // p) ** 2 + 1
    params = dict(
        word_emb=nrm((cfg["vocab"], H)),
        token_type_emb=nrm((1, H)),
        pos_emb=nrm((cfg["max_pos"], H)),
        x_pos_emb=nrm((cfg["max_2d_pos"], cfg["coord_size"])),
        y_pos_emb=nrm((cfg["max_2d_pos"], cfg["coord_size"])),
        h_pos_emb=nrm((cfg["max_2d_pos"], cfg["shape_size"])),
        w_pos_emb=nrm((cfg["max_2d_pos"], cfg["shape_size"])),
        text_ln_g=jnp.ones((H,), jnp.float32), text_ln_b=jnp.zeros((H,), jnp.float32),
        patch_w=nrm((C * p * p, H)).astype(jnp.bfloat16),
        patch_b=jnp.zeros((H,), jnp.float32),
        cls_token=nrm((1, 1, H)),
        vis_pos_emb=nrm((1, n_vis, H)),
        vis_ln_g=jnp.ones((H,), jnp.float32), vis_ln_b=jnp.zeros((H,), jnp.float32),
        final_ln_g=jnp.ones((H,), jnp.float32), final_ln_b=jnp.zeros((H,), jnp.float32),
        rel_pos_bias=nrm((cfg["rel_pos_bins"], NH)),
        rel_x_bias=nrm((cfg["rel_2d_pos_bins"], NH)),
        rel_y_bias=nrm((cfg["rel_2d_pos_bins"], NH)),
    )
    # Encoder weights stacked along a leading L axis (single pallas_call over a
    # layer grid axis).  The 1/sqrt(head_dim) attention-score scale is folded
    # into the Q third of the fused QKV weight (a real checkpoint's Q bias must
    # be scaled identically; here the synthetic biases are zero).
    scale = 1.0 / math.sqrt(HD)
    qscale = jnp.concatenate([jnp.full((H,), scale, jnp.float32),
                              jnp.ones((2 * H,), jnp.float32)])
    qkv_w = jnp.stack([nrm((H, 3 * H)) for _ in range(L)]) * qscale
    params["enc"] = dict(
        qkv_w=qkv_w.astype(jnp.bfloat16),
        qkv_b=jnp.zeros((L, 1, 3 * H), jnp.float32),
        ao_w=jnp.stack([nrm((H, H)) for _ in range(L)]).astype(jnp.bfloat16),
        ao_b=jnp.zeros((L, 1, H), jnp.float32),
        ln1_g=jnp.ones((L, 1, H), jnp.float32),
        ln1_b=jnp.zeros((L, 1, H), jnp.float32),
        i_w=jnp.stack([nrm((H, I)) for _ in range(L)]).astype(jnp.bfloat16),
        i_b=jnp.zeros((L, 1, I), jnp.float32),
        o_w=jnp.stack([nrm((I, H)) for _ in range(L)]).astype(jnp.bfloat16),
        o_b=jnp.zeros((L, 1, H), jnp.float32),
        ln2_g=jnp.ones((L, 1, H), jnp.float32),
        ln2_b=jnp.zeros((L, 1, H), jnp.float32),
    )
    return params


def relative_position_bucket(rel_pos, num_buckets, max_distance):
    num_buckets //= 2
    ret = (rel_pos > 0).astype(jnp.int32) * num_buckets
    n = jnp.abs(rel_pos)
    max_exact = num_buckets // 2
    is_small = n < max_exact
    val_if_large = max_exact + (
        jnp.log(jnp.maximum(n, 1).astype(jnp.float32) / max_exact)
        / math.log(max_distance / max_exact) * (num_buckets - max_exact)
    ).astype(jnp.int32)
    val_if_large = jnp.minimum(val_if_large, num_buckets - 1)
    return ret + jnp.where(is_small, n, val_if_large)


def make_visual_bbox(size, max_len=1000):
    xs = jnp.arange(0, max_len * (size + 1), max_len) // size
    x0 = jnp.tile(xs[:-1][None, :], (size, 1))
    y0 = jnp.tile(xs[:-1][:, None], (1, size))
    x1 = jnp.tile(xs[1:][None, :], (size, 1))
    y1 = jnp.tile(xs[1:][:, None], (1, size))
    vb = jnp.stack([x0, y0, x1, y1], axis=-1).reshape(-1, 4)
    cls_box = jnp.array([[1, 1, max_len - 1, max_len - 1]], dtype=vb.dtype)
    return jnp.concatenate([cls_box, vb], axis=0).astype(jnp.int32)


def patentmme_forward(params, cfg, images, ocr_input_ids, ocr_attention_mask, ocr_bboxes):
    B, C, Himg, _ = images.shape
    T = ocr_input_ids.shape[1]
    p = cfg["patch"]
    size = Himg // p
    n_patch = size * size
    n_vis = n_patch + 1
    H, NH = cfg["hidden"], cfg["heads"]
    S = T + n_vis
    # TODO(synk): at production S (~750) pad to a multiple of 128 for lane-dense
    #             (S,S) tiles; at tiny S only sublane-align.
    S_pad = _round_up(S, 8)
    pad = S_pad - S

    # ---------------- text embeddings (LayoutLMv3TextEmbeddings) ----------------
    pad_mask = (ocr_input_ids != cfg["pad_id"]).astype(jnp.int32)
    position_ids = jnp.cumsum(pad_mask, axis=1) * pad_mask + cfg["pad_id"]
    word = jnp.take(params["word_emb"], ocr_input_ids, axis=0)
    ttype = jnp.take(params["token_type_emb"], jnp.zeros_like(ocr_input_ids), axis=0)
    pose = jnp.take(params["pos_emb"], position_ids, axis=0)
    left = jnp.take(params["x_pos_emb"], ocr_bboxes[:, :, 0], axis=0)
    upper = jnp.take(params["y_pos_emb"], ocr_bboxes[:, :, 1], axis=0)
    right = jnp.take(params["x_pos_emb"], ocr_bboxes[:, :, 2], axis=0)
    lower = jnp.take(params["y_pos_emb"], ocr_bboxes[:, :, 3], axis=0)
    h_e = jnp.take(params["h_pos_emb"],
                   jnp.clip(ocr_bboxes[:, :, 3] - ocr_bboxes[:, :, 1], 0,
                            cfg["max_2d_pos"] - 1), axis=0)
    w_e = jnp.take(params["w_pos_emb"],
                   jnp.clip(ocr_bboxes[:, :, 2] - ocr_bboxes[:, :, 0], 0,
                            cfg["max_2d_pos"] - 1), axis=0)
    spatial = jnp.concatenate([left, upper, right, lower, h_e, w_e], axis=-1)
    text_emb = word + ttype + pose + spatial
    text_emb = pallas_layernorm(text_emb.reshape(B * T, H),
                                params["text_ln_g"], params["text_ln_b"],
                                eps=1e-5).reshape(B, T, H)

    # ---------------- visual embeddings (forward_image) ----------------
    patches = images.reshape(B, C, size, p, size, p)
    patches = patches.transpose(0, 2, 4, 1, 3, 5).reshape(B * n_patch, C * p * p)
    vis = pallas_linear(patches, params["patch_w"], params["patch_b"]).reshape(B, n_patch, H)
    cls = jnp.broadcast_to(params["cls_token"], (B, 1, H))
    vis = jnp.concatenate([cls, vis], axis=1) + params["vis_pos_emb"]
    vis = pallas_layernorm(vis.reshape(B * n_vis, H),
                           params["vis_ln_g"], params["vis_ln_b"],
                           eps=1e-6).reshape(B, n_vis, H)

    # ---------------- concat + final LN; residual stream stored bf16 ------------
    emb = jnp.concatenate([text_emb, vis], axis=1)
    emb = pallas_layernorm(emb.reshape(B * S, H),
                           params["final_ln_g"], params["final_ln_b"],
                           eps=1e-5).reshape(B, S, H)
    emb = jnp.pad(emb, ((0, 0), (0, pad), (0, 0)))                     # (B, S_pad, H)
    emb_bf16 = emb.astype(jnp.bfloat16)

    # ---------------- rel-pos bias (1D + 2D) with attention mask folded in ------
    full_mask = jnp.concatenate(
        [ocr_attention_mask.astype(jnp.float32), jnp.ones((B, n_vis), jnp.float32)], axis=1)
    full_mask = jnp.pad(full_mask, ((0, 0), (0, pad)))                 # padded keys masked
    mask_add = (full_mask - 1.0) * 1e9                                 # (B, S_pad)

    text_pos = jnp.broadcast_to(jnp.arange(T, dtype=jnp.int32)[None], (B, T))
    vis_pos = jnp.broadcast_to(jnp.arange(n_vis, dtype=jnp.int32)[None], (B, n_vis))
    final_pos = jnp.pad(jnp.concatenate([text_pos, vis_pos], axis=1), ((0, 0), (0, pad)))
    vis_bbox = make_visual_bbox(size)
    final_bbox = jnp.concatenate(
        [ocr_bboxes, jnp.broadcast_to(vis_bbox[None], (B, n_vis, 4))], axis=1)
    final_bbox = jnp.pad(final_bbox, ((0, 0), (0, pad), (0, 0)))

    rel_mat = final_pos[:, None, :] - final_pos[:, :, None]            # [b,i,j] = p_j - p_i
    rp = relative_position_bucket(rel_mat, cfg["rel_pos_bins"], cfg["max_rel_pos"])
    cx, cy = final_bbox[:, :, 0], final_bbox[:, :, 3]
    bx = relative_position_bucket(cx[:, None, :] - cx[:, :, None],
                                  cfg["rel_2d_pos_bins"], cfg["max_rel_2d_pos"])
    by = relative_position_bucket(cy[:, None, :] - cy[:, :, None],
                                  cfg["rel_2d_pos_bins"], cfg["max_rel_2d_pos"])
    bias = (jnp.take(params["rel_pos_bias"], rp, axis=0)
            + jnp.take(params["rel_x_bias"], bx, axis=0)
            + jnp.take(params["rel_y_bias"], by, axis=0))              # (B,S_pad,S_pad,NH)
    bias = bias * (1.0 / math.sqrt(cfg["head_dim"]))
    bias = bias.transpose(3, 0, 1, 2) + mask_add[None, :, None, :]     # mask folded in
    # TODO(synk): at large S recompute the bias in-kernel from the tiny bucket
    #             tables + int bucket planes instead of streaming NH*S^2 bf16.
    bias_bf16 = bias.astype(jnp.bfloat16)                              # (NH,B,S_pad,S_pad)

    # ---------------- encoder: one pallas_call for ALL layers -------------------
    bt = _pick_bt(B, NH, S_pad, H)
    layer_out = pallas_encoder(params["enc"], emb_bf16, bias_bf16, cfg, bt=bt)
    hidden_states = [emb_bf16] + [layer_out[i] for i in range(cfg["layers"])]

    # ---------------- feature select ----------------
    feats = hidden_states[cfg["select_layer"]][:, :S]                  # drop seq padding
    if cfg["select_feature"] == "patch":
        feats = feats[:, 1:]
    elif cfg["select_feature"] != "cls_patch":
        raise ValueError(f"Unexpected select feature: {cfg['select_feature']}")
    return feats.astype(images.dtype)


# -----------------------------------------------------------------------------
if __name__ == "__main__":
    cfg = CFG
    key = jax.random.PRNGKey(0)
    kp, ki, kid, kb = jax.random.split(key, 4)
    params = init_params(cfg, kp)

    B, T = 2, 8
    images = jax.random.normal(ki, (B, cfg["channels"], cfg["image_size"], cfg["image_size"]),
                               dtype=jnp.float32)
    ids = jax.random.randint(kid, (B, T), 2, cfg["vocab"], dtype=jnp.int32)
    ids = ids.at[:, 0].set(0)
    ids = ids.at[1, T - 1].set(cfg["pad_id"])                      # one padded token
    attn_mask = jnp.ones((B, T), jnp.float32).at[1, T - 1].set(0.0)
    pts = jax.random.randint(kb, (B, T, 2, 2), 0, 1000, dtype=jnp.int32)
    pts = jnp.sort(pts, axis=-1)
    bbox = jnp.stack([pts[..., 0, 0], pts[..., 1, 0], pts[..., 0, 1], pts[..., 1, 1]], axis=-1)

    feats = patentmme_forward(params, cfg, images, ids, attn_mask, bbox)
    feats = jax.block_until_ready(feats)

    n_vis = (cfg["image_size"] // cfg["patch"]) ** 2 + 1
    assert feats.shape == (B, T + n_vis - 1, cfg["hidden"]), feats.shape
    assert bool(jnp.all(jnp.isfinite(feats)))
    print("KERNEL_OK")
</pallas_src>

<mosaic_0001>
module attributes {stable_mosaic.version = 11 : i64} {
  func.func @_layernorm_kernel(%arg0: i32, %arg1: memref<16x128xf32, #tpu.memory_space<vmem>>, %arg2: memref<1x128xf32, #tpu.memory_space<vmem>>, %arg3: memref<1x128xf32, #tpu.memory_space<vmem>>, %arg4: memref<16x128xf32, #tpu.memory_space<vmem>>) attributes {dimension_semantics = [#tpu.dimension_semantics<parallel>], iteration_bounds = array<i64: 1>, scalar_prefetch = 0 : i64, scratch_operands = 0 : i64, tpu.core_type = #tpu.core_type<tc>, window_params = [{transform_indices = @transform_0, window_bounds = array<i64: 16, 128>}, {pipeline_mode = #tpu.pipeline_mode<synchronous>, transform_indices = @transform_1, window_bounds = array<i64: 1, 128>}, {pipeline_mode = #tpu.pipeline_mode<synchronous>, transform_indices = @transform_2, window_bounds = array<i64: 1, 128>}, {transform_indices = @transform_3, window_bounds = array<i64: 16, 128>}]} {
    %c0 = arith.constant 0 : index
    %c0_0 = arith.constant 0 : index
    %0 = vector.load %arg1[%c0, %c0_0] : memref<16x128xf32, #tpu.memory_space<vmem>>, vector<16x128xf32>
    %c0_1 = arith.constant 0 : index
    %c0_2 = arith.constant 0 : index
    %1 = vector.load %arg2[%c0_1, %c0_2] : memref<1x128xf32, #tpu.memory_space<vmem>>, vector<1x128xf32>
    %c0_3 = arith.constant 0 : index
    %c0_4 = arith.constant 0 : index
    %2 = vector.load %arg3[%c0_3, %c0_4] : memref<1x128xf32, #tpu.memory_space<vmem>>, vector<1x128xf32>
    %cst = arith.constant dense<0.000000e+00> : vector<16xf32>
    %3 = vector.multi_reduction <add>, %0, %cst [1] : vector<16x128xf32> to vector<16xf32>
    %4 = vector.shape_cast %3 : vector<16xf32> to vector<16x1xf32>
    %cst_5 = arith.constant 1.280000e+02 : f32
    %5 = vector.broadcast %cst_5 : f32 to vector<16x1xf32>
    %6 = arith.divf %4, %5 : vector<16x1xf32>
    %7 = vector.broadcast %6 : vector<16x1xf32> to vector<16x128xf32>
    %8 = arith.subf %0, %7 : vector<16x128xf32>
    %9 = arith.mulf %8, %8 : vector<16x128xf32>
    %cst_6 = arith.constant dense<0.000000e+00> : vector<16xf32>
    %10 = vector.multi_reduction <add>, %9, %cst_6 [1] : vector<16x128xf32> to vector<16xf32>
    %11 = vector.shape_cast %10 : vector<16xf32> to vector<16x1xf32>
    %cst_7 = arith.constant 1.280000e+02 : f32
    %12 = vector.broadcast %cst_7 : f32 to vector<16x1xf32>
    %13 = arith.divf %11, %12 : vector<16x1xf32>
    %14 = vector.broadcast %6 : vector<16x1xf32> to vector<16x128xf32>
    %15 = arith.subf %0, %14 : vector<16x128xf32>
    %cst_8 = arith.constant 9.99999974E-6 : f32
    %16 = vector.broadcast %cst_8 : f32 to vector<16x1xf32>
    %17 = arith.addf %13, %16 : vector<16x1xf32>
    %18 = math.rsqrt %17 : vector<16x1xf32>
    %19 = vector.broadcast %18 : vector<16x1xf32> to vector<16x128xf32>
    %20 = arith.mulf %15, %19 : vector<16x128xf32>
    %21 = vector.broadcast %1 : vector<1x128xf32> to vector<16x128xf32>
    %22 = arith.mulf %20, %21 : vector<16x128xf32>
    %23 = vector.broadcast %2 : vector<1x128xf32> to vector<16x128xf32>
    %24 = arith.addf %22, %23 : vector<16x128xf32>
    %c0_9 = arith.constant 0 : index
    %c0_10 = arith.constant 0 : index
    %25 = vector.load %arg4[%c0_9, %c0_10] : memref<16x128xf32, #tpu.memory_space<vmem>>, vector<16x128xf32>
    tpu.vector_store %arg4[%c0_9, %c0_10], %24 {strides = array<i32>} : memref<16x128xf32, #tpu.memory_space<vmem>>, vector<16x128xf32>,
    return
  }
  func.func @transform_0(%arg0: i32) -> (i32, i32) {
    %c0_i32 = arith.constant 0 : i32
    %c0_i32_0 = arith.constant 0 : i32
    return %arg0, %c0_i32 : i32, i32
  }
  func.func @transform_1(%arg0: i32) -> (i32, i32) {
    %c0_i32 = arith.constant 0 : i32
    %c0_i32_0 = arith.constant 0 : i32
    %c0_i32_1 = arith.constant 0 : i32
    return %c0_i32, %c0_i32_0 : i32, i32
  }
  func.func @transform_2(%arg0: i32) -> (i32, i32) {
    %c0_i32 = arith.constant 0 : i32
    %c0_i32_0 = arith.constant 0 : i32
    %c0_i32_1 = arith.constant 0 : i32
    return %c0_i32, %c0_i32_0 : i32, i32
  }
  func.func @transform_3(%arg0: i32) -> (i32, i32) {
    %c0_i32 = arith.constant 0 : i32
    %c0_i32_0 = arith.constant 0 : i32
    return %arg0, %c0_i32 : i32, i32
  }
}

</mosaic_0001>

<bundles_post_ra>
// kernel: tpu_custom_call.1
= control target key start
LH: loop header
LB: loop body
LE: loop exit
PB: predicated region body
PF: predicated region fallthrough
CT: control target
= control target key end

     0   :  { %8 = vsyncpa [#allocation3], 0  ;;  %s187_s0 = inlined_call_operand.hbm [shape: f32[16,128], index: 0, kind: input, shape index: {}]   ;;  %s188_s1 = inlined_call_operand.vmem [shape: f32[1,128], index: 1, kind: input, shape index: {}]   ;;  %s189_s2 = inlined_call_operand.vmem [shape: f32[1,128], index: 2, kind: input, shape index: {}]   ;;  %s190_s3 = inlined_call_operand.hbm [shape: f32[16,128], index: 3, kind: output, shape index: {}]  }
   0x1   :  { %9 = vsyncpa [#allocation4], 0  ;;  %s145_s12 = smov [#allocation2]  }
   0x2   :  { %s15_s13 = sshll.u32 %s145_s12, 4  ;;  %s16_s13 = int_to_ptr.vmem [resolvable:$true] %s15_s13 }
   0x3   :  { %s109_s14 = scalar_lea.vmem %s16_s13, 256  ;;  %p114_p1 = scmp.lt.s32.totalorder %s16_s13, %s16_s13 }
   0x4   :  { %p110_p0 = scmp.ne.s32.totalorder %s16_s13, %s109_s14  ;;  %p115_p2 = scmp.lt.s32.totalorder %s109_s14, %s109_s14 }
   0x6   :  { %p116_p3 = por %p115_p2, %p114_p1 }
   0x8   :  { %p117_p4 = pnand %p116_p3, %p110_p0 }
   0xa   :  { %120 = shalt.err (!%p117_p4)
}
   0xb   :  { %s146_s15 = smov 128   ;;  %s147_s16 = smov 8  }
   0xc   :  { %21 = dma.hbm_to_vmem [thread:$0]  %s187_s0, 256, %s16_s13, [#allocation3], %s146_s15, %s146_s15, %s147_s16  }
   0xd   :  { %141 = dma.done.wait [#allocation3], 256  }
   0xe   :  { %142 = vsyncadd [#allocation3], 4294967040  ;;  %v29_v0 = vld [vmem:[#allocation2] sm:$0xff]  ;;  %v30_v1 = vld [vmem:[#allocation2 + $0x8] sm:$0xff]  ;;  %s148_s22 = smov [#allocation5]  }
   0xf   :  { %33 = vadd.xlane.f32.xlu0 %v29_v0  ;;  %v91_v17 = vld [vmem:[%s188_s1] ss:$0 sm:$0xff]  ;;  %s79_s23 = sshll.u32 %s148_s22, 4  ;;  %s80_s23 = int_to_ptr.vmem [resolvable:$true] %s79_s23 }
  0x10   :  { %v92_v19 = vld [vmem:[%s189_s2] ss:$0 sm:$0xff]  ;;  %s121_s24 = scalar_lea.vmem %s80_s23, 256  ;;  %p126_p6 = scmp.lt.s32.totalorder %s80_s23, %s80_s23 }
  0x11   :  { %p122_p5 = scmp.ne.s32.totalorder %s80_s23, %s121_s24  ;;  %p127_p7 = scmp.lt.s32.totalorder %s121_s24, %s121_s24 }
  0x13   :  { %35 = vadd.xlane.f32.xlu0 %v30_v1  ;;  %p128_p8 = por %p127_p7, %p126_p6 }
  0x15   :  { %p129_p9 = pnand %p128_p8, %p122_p5 }
  0x98   :  { %v34_v2 = vpop.xlane.xlu0 %33 }
  0x99   :  { %v38_v3 = vmul.f32 0.0078125, %v34_v2 }
  0x9b   :  { %v40_v4 = vsub.f32 %v29_v0, %v38_v3 }
  0x9c   :  { %v36_v5 = vpop.xlane.xlu0 %35 }
  0x9d   :  { %v39_v6 = vmul.f32 0.0078125, %v36_v5  ;;  %v42_v7 = vmul.f32 %v40_v4, %v40_v4 }
  0x9f   :  { %v41_v8 = vsub.f32 %v30_v1, %v39_v6  ;;  %44 = vadd.xlane.f32.xlu1 %v42_v7 }
  0xa1   :  { %v43_v9 = vmul.f32 %v41_v8, %v41_v8 }
  0xa3   :  { %46 = vadd.xlane.f32.xlu1 %v43_v9 }
 0x128   :  { %v45_v10 = vpop.xlane.xlu1 %44 }
 0x129   :  { %v48_v11 = vmul.f32 0.0078125, %v45_v10 }
 0x12b   :  { %v50_v12 = vadd.f32 1e-05, %v48_v11 }
 0x12c   :  { %v47_v13 = vpop.xlane.xlu1 %46 }
 0x12d   :  { %97 = vrsqrt.f32 %v50_v12  ;;  %v49_v14 = vmul.f32 0.0078125, %v47_v13 }
 0x12f   :  { %v51_v15 = vadd.f32 1e-05, %v49_v14 }
 0x131   :  { %99 = vrsqrt.f32 %v51_v15 }
 0x13a   :  { %v98_v16 = vpop.eup %97 }
 0x13b   :  { %v54_v18 = vmul.f32 %v98_v16, %v40_v4 }
 0x13d   :  { %v62_v20 = vmul.f32 %v91_v17, %v54_v18 }
 0x13e   :  { %v100_v21 = vpop.eup %99 }
 0x13f   :  { %v55_v22 = vmul.f32 %v100_v21, %v41_v8  ;;  %v70_v23 = vadd.f32 %v92_v19, %v62_v20 }
 0x141   :  { %v63_v24 = vmul.f32 %v91_v17, %v55_v22  ;;  %72 = vst [vmem:[#allocation5] sm:$0xff] %v70_v23 }
 0x143   :  { %v71_v25 = vadd.f32 %v92_v19, %v63_v24 }
 0x145   :  { %73 = vst [vmem:[#allocation5 + $0x8] sm:$0xff] %v71_v25 }
 0x146   :  { %132 = shalt.err (!%p129_p9)
}
 0x147   :  { %85 = dma.vmem_to_hbm [thread:$0]  %s80_s23, 256, %s190_s3, [#allocation4], %s146_s15, %s146_s15, %s147_s16  }
 0x148   :  { %143 = dma.done.wait [#allocation4], 256  }
 0x149   :  { %144 = vsyncadd [#allocation4], 4294967040 }
 0x14a   :  { %89 = vsyncpa [#allocation3], 1 }
 0x14b   :  { %90 = vsyncpa [#allocation4], 1 }

</bundles_post_ra>
